<compile_context>
chip_gen: v6e
topology: v6e:2x2x1
jax: 0.10.0
libtpu: 0.0.40
codegen_flags: <defaults>
</compile_context>

<pallas_src>
import functools

import numpy as np
import jax
import jax.numpy as jnp
from jax import lax
from jax.experimental import pallas as pl
from jax.experimental.pallas import tpu as pltpu


def _round_up(x, m):
    return (x + m - 1) // m * m


# ---------------------------------------------------------------------------
# Kernel 1: masked softmax + attention-weighted input average for S sentences
#           per grid step.  grid = (ceil(mb / S),), "parallel".
# ---------------------------------------------------------------------------
def _attn_kernel(off_ref, len_ref, x_ref, weff_ref, *out_refs,
                 S, n_distinct, d_l, L_pad, sub, emit_attn):
    if emit_attn:
        attn_ref, xbar_ref = out_refs
    else:
        (xbar_ref,) = out_refs

    j = pl.program_id(0)
    # Static unroll over the S sentences of this chunk (static slices for the
    # output stores; per-iteration footprint is a handful of vregs).
    for s in range(S):
        g = j * S + s                                   # global sentence index
        r = g % n_distinct                              # dedup'd w_eff row
        w = weff_ref[r]                                 # (d_l, d_model)
        off = pl.multiple_of(off_ref[g], sub)           # sublane-aligned start
        ln = len_ref[g]

        xs = x_ref[0, pl.ds(off, L_pad), :]             # (L_pad, d_model)

        # scores[h, l] = sum_d w[h, d] * xs[l, d]   (MXU, f32 accumulation)
        scores = lax.dot_general(w, xs, (((1,), (1,)), ((), ())),
                                 preferred_element_type=jnp.float32)

        col = lax.broadcasted_iota(jnp.int32, scores.shape, 1)
        scores = jnp.where(col < ln, scores, -1e30)     # finite mask, robust

        mx = jnp.max(scores, axis=-1, keepdims=True)
        e = jnp.exp(scores - mx)
        denom = jnp.sum(e, axis=-1, keepdims=True)
        p = e * pl.reciprocal(denom, approx=False)      # exact: attn is returned

        if emit_attn:
            attn_ref[0, s * d_l:(s + 1) * d_l, :] = p
        # xbar[h] = sum_l p[h, l] * xs[l]; V / proj / reduce applied to this
        # (d_l, d_model) summary instead of every token (rank-1 attention).
        xbar_ref[0, s * d_l:(s + 1) * d_l, :] = jnp.dot(
            p.astype(xs.dtype), xs, preferred_element_type=jnp.float32)


# ---------------------------------------------------------------------------
# Kernel 2: per-token combine + per-label LayerNorm, lane-dense final layout.
#           grid over token tiles, "parallel".
# ---------------------------------------------------------------------------
def _combine_kernel(inp_ref, bnd_ref, wred_ref, redctx_ref, rep_ref,
                    grp_ref, grpt_ref, gb_ref, out_ref, *, d_proj, eps):
    tile_t = inp_ref.shape[0]
    mb = bnd_ref.shape[1] - 1
    pid = pl.program_id(0)

    redctx = redctx_ref[...]                            # (mb, d_l*d_proj)  cdt
    rep = rep_ref[...]                                  # (d_proj, d_l*d_proj) cdt
    grp = grp_ref[...]                                  # (d_l*d_proj, d_l) f32
    grpt = grpt_ref[...]                                # (d_l, d_l*d_proj) f32

    # Sentence one-hot from boundary compares (no 1-lane-wide bid stream).
    gidx = pid * tile_t + lax.broadcasted_iota(jnp.int32, (tile_t, mb), 0)
    lo = bnd_ref[0:1, 0:mb]
    hi = bnd_ref[0:1, 1:mb + 1]
    onehot = jnp.logical_and(gidx >= lo, gidx < hi).astype(redctx.dtype)

    # reduce_proj(inp): shared across labels (f32 accumulation on the MXU).
    red_inp = jnp.dot(inp_ref[...], wred_ref[...],
                      preferred_element_type=jnp.float32)          # (tile, d_proj)

    # Gather sentence-level context (MXU one-hot matmul) and broadcast the
    # shared residual term across labels with one block-identity matmul.
    z = jnp.dot(onehot, redctx, preferred_element_type=jnp.float32)
    z = z + jnp.dot(red_inp.astype(rep.dtype), rep,
                    preferred_element_type=jnp.float32)            # (tile, d_l*d_proj)

    # Per-label LayerNorm over groups of d_proj lanes via group-sum matmuls
    # (constants are resident inputs; stats stay in f32).
    mu = jnp.dot(z, grp, preferred_element_type=jnp.float32) * (1.0 / d_proj)
    diff = z - jnp.dot(mu, grpt, preferred_element_type=jnp.float32)
    var = jnp.dot(diff * diff, grp,
                  preferred_element_type=jnp.float32) * (1.0 / (d_proj - 1))
    inv = pl.reciprocal(jnp.sqrt(var) + eps, approx=False)         # (tile, d_l)
    inv_full = jnp.dot(inv, grpt, preferred_element_type=jnp.float32)

    gamma = gb_ref[0:1, :]
    beta = gb_ref[1:2, :]
    out_ref[...] = (diff * inv_full * gamma + beta).astype(out_ref.dtype)


# ---------------------------------------------------------------------------
# Wrapper
# ---------------------------------------------------------------------------
def label_attention_forward(inp, boundaries, params, *, d_l, d_k, d_v,
                            d_model, d_proj, compute_dtype=jnp.bfloat16,
                            token_tile=256, sent_block=8, return_attn=True):
    # NOTE: boundaries are static Python ints -> each distinct boundary tuple
    # retraces (inherent to static-shape padding, same as torch's per-batch max_len).
    cdt = jnp.dtype(compute_dtype)
    sub = 16 if cdt.itemsize == 2 else 8                    # sublane tile for cdt

    len_inp = int(inp.shape[0])
    boundaries = tuple(int(b) for b in boundaries)
    mb = len(boundaries) - 1
    lengths_np = np.diff(np.asarray(boundaries)).astype(np.int32)   # (mb,)
    L = int(lengths_np.max())
    L_pad = _round_up(L, sub)

    # ---- chunk S sentences per grid step (amortize per-step overhead) --------
    S = max(1, min(int(sent_block), mb))
    num_chunks = -(-mb // S)
    mb_pad = num_chunks * S

    sent_off_np = np.zeros((mb_pad,), np.int32)             # offset inside chunk
    sent_len_np = np.zeros((mb_pad,), np.int32)
    sent_len_np[:mb] = lengths_np
    chunk_alloc = L_pad
    for j in range(num_chunks):
        off = 0
        for s in range(S):
            m = j * S + s
            if m >= mb:
                break
            sent_off_np[m] = off
            chunk_alloc = max(chunk_alloc, off + L_pad)     # in-kernel window bound
            off += _round_up(int(lengths_np[m]), sub)       # keep starts aligned
    C_alloc = _round_up(chunk_alloc, sub)

    # Near-dense per-chunk repack of the token matrix (written in compute dtype;
    # only ~sub-1 pad rows per sentence, no per-sentence L_pad inflation).
    src = np.full((num_chunks, C_alloc), len_inp, np.int32)         # len_inp -> zero row
    for m in range(mb):
        j = m // S
        o = int(sent_off_np[m])
        ln = int(lengths_np[m])
        src[j, o:o + ln] = np.arange(boundaries[m], boundaries[m + 1])
    x_ext = jnp.concatenate([inp.astype(cdt), jnp.zeros((1, d_model), cdt)], axis=0)
    x_chunks = x_ext[src]                                   # (num_chunks, C_alloc, d_model)

    # ---- deduplicated folded key/query table ----------------------------------
    # Reproduces the original q_s.repeat(mb,1,1) ordering exactly: flat bmm batch
    # b = h*mb + m uses query w_qs[(h*mb+m) % d_l], which depends on m only
    # through m % d_l -> n_distinct = min(mb, d_l) rows.
    n_distinct = min(mb, d_l)
    h_idx = np.arange(d_l)[:, None]
    r_idx = np.arange(n_distinct)[None, :]
    q_sel = (h_idx * mb + r_idx) % d_l                      # (d_l, n_distinct)
    q_per = params['w_qs'][q_sel]                           # (d_l, n_distinct, d_k)
    w_eff_table = (jnp.einsum('hdk,hrk->rhd', params['w_ks'], q_per)
                   / float(d_model) ** 0.5)                 # (n_distinct, d_l, d_model)

    sent_off = jnp.asarray(sent_off_np)
    sent_len = jnp.asarray(sent_len_np)

    attn_spec = pl.BlockSpec((1, S * d_l, L_pad), lambda j, off, ln: (j, 0, 0))
    xbar_spec = pl.BlockSpec((1, S * d_l, d_model), lambda j, off, ln: (j, 0, 0))
    if return_attn:
        out_specs = (attn_spec, xbar_spec)
        out_shape = (jax.ShapeDtypeStruct((num_chunks, S * d_l, L_pad), jnp.float32),
                     jax.ShapeDtypeStruct((num_chunks, S * d_l, d_model), jnp.float32))
    else:
        out_specs = (xbar_spec,)
        out_shape = (jax.ShapeDtypeStruct((num_chunks, S * d_l, d_model), jnp.float32),)

    k1 = functools.partial(_attn_kernel, S=S, n_distinct=n_distinct, d_l=d_l,
                           L_pad=L_pad, sub=sub, emit_attn=return_attn)
    res = pl.pallas_call(
        k1,
        grid_spec=pltpu.PrefetchScalarGridSpec(
            num_scalar_prefetch=2,
            grid=(num_chunks,),
            in_specs=[
                pl.BlockSpec((1, C_alloc, d_model), lambda j, off, ln: (j, 0, 0)),
                # grid-constant (resident) deduplicated w_eff table
                pl.BlockSpec((n_distinct, d_l, d_model), lambda j, off, ln: (0, 0, 0)),
            ],
            out_specs=out_specs,
        ),
        out_shape=out_shape,
        compiler_params=pltpu.CompilerParams(dimension_semantics=("parallel",)),
    )(sent_off, sent_len, x_chunks, w_eff_table.astype(cdt))

    if return_attn:
        attn, xbar = res
    else:
        (xbar,) = res
        attn = None

    # ---- tiny per-(sentence,label) chain with the V/proj/reduce weights folded
    # into one (d_l, d_model, d_proj) matrix (rank-1 reassociation already
    # removed the per-token V projection).
    vp = params['w_proj'].T @ params['w_reduce'].T          # (d_v, d_proj)
    w_chain = jnp.einsum('hdv,vp->hdp', params['w_vs'], vp)  # (d_l, d_model, d_proj)
    xbar = xbar.reshape(mb_pad, d_l, d_model)[:mb]          # (mb, d_l, d_model) f32
    red_ctx = jnp.einsum('mhd,hdp->mhp', xbar, w_chain)     # (mb, d_l, d_proj)
    dlp = d_l * d_proj
    red_ctx_2d = red_ctx.reshape(mb, dlp).astype(cdt)

    # ---- kernel 2: per-token combine + per-label LayerNorm --------------------
    # token_tile=256 keeps double-buffered blocks within v7x's tighter VMEM;
    # raise to 512 and set vmem_limit_bytes on v5e/v6e for production shapes.
    tile_t = _round_up(min(int(token_tile), _round_up(len_inp, sub)), sub)
    t_pad = _round_up(len_inp, tile_t)
    inp_pad = jnp.zeros((t_pad, d_model), cdt).at[:len_inp].set(inp.astype(cdt))
    bounds2d = jnp.asarray(np.asarray(boundaries, np.int32)[None, :])   # (1, mb+1)
    wred = params['w_reduce'].T.astype(cdt)                 # (d_model, d_proj)
    # Precomputed constants (hoisted out of the kernel, resident via (0,0) maps):
    rep = jnp.asarray(np.kron(np.ones((1, d_l), np.float32),
                              np.eye(d_proj, dtype=np.float32))).astype(cdt)    # (d_proj, dlp)
    grp = jnp.asarray(np.kron(np.eye(d_l, dtype=np.float32),
                              np.ones((d_proj, 1), np.float32)))                # (dlp, d_l)
    grpt = jnp.asarray(np.kron(np.eye(d_l, dtype=np.float32),
                               np.ones((1, d_proj), np.float32)))               # (d_l, dlp)
    gb = jnp.stack([jnp.tile(params['ln_gamma'], d_l),
                    jnp.tile(params['ln_beta'], d_l)]).astype(jnp.float32)       # (2, dlp)

    k2 = functools.partial(_combine_kernel, d_proj=d_proj, eps=1e-3)
    out_pad = pl.pallas_call(
        k2,
        grid=(t_pad // tile_t,),
        in_specs=[
            pl.BlockSpec((tile_t, d_model), lambda t: (t, 0)),
            pl.BlockSpec((1, mb + 1), lambda t: (0, 0)),
            pl.BlockSpec((d_model, d_proj), lambda t: (0, 0)),
            pl.BlockSpec((mb, dlp), lambda t: (0, 0)),
            pl.BlockSpec((d_proj, dlp), lambda t: (0, 0)),
            pl.BlockSpec((dlp, d_l), lambda t: (0, 0)),
            pl.BlockSpec((d_l, dlp), lambda t: (0, 0)),
            pl.BlockSpec((2, dlp), lambda t: (0, 0)),
        ],
        out_specs=pl.BlockSpec((tile_t, dlp), lambda t: (t, 0)),
        out_shape=jax.ShapeDtypeStruct((t_pad, dlp), cdt),
        compiler_params=pltpu.CompilerParams(dimension_semantics=("parallel",)),
    )(inp_pad, bounds2d, wred, red_ctx_2d, rep, grp, grpt, gb)

    outputs = out_pad[:len_inp]                             # (len_inp, d_l*d_proj)
    if return_attn:
        attns = attn.reshape(mb_pad, d_l, L_pad)[:mb, :, :L]
        attns = jnp.transpose(attns, (1, 0, 2)).reshape(d_l * mb, 1, L)
    else:
        attns = None
    return outputs, attns


# ---------------------------------------------------------------------------
# Pure-JAX reference (mirrors torch semantics, f32) for verification
# ---------------------------------------------------------------------------
def reference_forward(inp, boundaries, params, *, d_l, d_k, d_v, d_model, d_proj):
    len_inp = inp.shape[0]
    mb = len(boundaries) - 1
    L = max(int(boundaries[i + 1] - boundaries[i]) for i in range(mb))

    k_s = jnp.einsum('nd,ldk->lnk', inp, params['w_ks'])
    v_s = jnp.einsum('nd,ldv->lnv', inp, params['w_vs'])
    q_s = params['w_qs'][:, None, :]                       # (d_l, 1, d_k)

    k_pad = jnp.zeros((d_l, mb, L, d_k), jnp.float32)
    v_pad = jnp.zeros((d_l, mb, L, d_v), jnp.float32)
    invalid = jnp.ones((mb, L), bool)
    batch_id = []
    for i, (s, e) in enumerate(zip(boundaries[:-1], boundaries[1:])):
        k_pad = k_pad.at[:, i, : e - s].set(k_s[:, s:e])
        v_pad = v_pad.at[:, i, : e - s].set(v_s[:, s:e])
        invalid = invalid.at[i, : e - s].set(False)
        batch_id += [i] * (e - s)
    batch_id = jnp.asarray(batch_id, jnp.int32)

    q_padded = jnp.tile(q_s, (mb, 1, 1))                   # (mb*d_l, 1, d_k)
    k_padded = k_pad.reshape(-1, L, d_k)
    v_padded = v_pad.reshape(-1, L, d_v)
    attn_mask = jnp.tile(invalid[:, None, :], (d_l, 1, 1))

    attn = jnp.einsum('bqk,blk->bql', q_padded, k_padded) / (d_model ** 0.5)
    attn = jnp.where(attn_mask, -jnp.inf, attn)
    attn = jax.nn.softmax(attn, axis=-1)
    outputs_padded = jnp.einsum('bql,blv->bqv', attn, v_padded)   # (B, 1, d_v)

    outputs_v = outputs_padded[:, 0, :].reshape(d_l, mb, d_v)[:, batch_id, :]
    outputs = jnp.transpose(outputs_v, (1, 0, 2))          # (len_inp, d_l, d_v)
    outputs = outputs @ params['w_proj'].T                 # proj: d_v -> d_model
    outputs = outputs + inp[:, None, :]                    # residual per label
    outputs = outputs @ params['w_reduce'].T               # reduce_proj: d_model -> d_proj
    mu = outputs.mean(-1, keepdims=True)
    sigma = jnp.sqrt(jnp.sum((outputs - mu) ** 2, -1, keepdims=True) / (d_proj - 1))
    outputs = (outputs - mu) / (sigma + 1e-3)
    outputs = outputs * params['ln_gamma'] + params['ln_beta']
    return outputs.reshape(len_inp, -1), attn


# ---------------------------------------------------------------------------
if __name__ == "__main__":
    d_model, d_k, d_v, d_l, d_proj = 32, 16, 16, 4, 8
    boundaries = (0, 5, 13)        # 2 packed sentences, lengths 5 and 8
    len_inp = boundaries[-1]
    mb = len(boundaries) - 1
    L = max(boundaries[i + 1] - boundaries[i] for i in range(mb))

    key = jax.random.PRNGKey(0)
    ks = jax.random.split(key, 8)
    params = {
        'w_qs': jax.random.normal(ks[0], (d_l, d_k), jnp.float32) * 0.3,
        'w_ks': jax.random.normal(ks[1], (d_l, d_model, d_k), jnp.float32) * 0.2,
        'w_vs': jax.random.normal(ks[2], (d_l, d_model, d_v), jnp.float32) * 0.2,
        'w_proj': jax.random.normal(ks[3], (d_model, d_v), jnp.float32) * 0.2,      # Linear(d_v, d_model).weight
        'w_reduce': jax.random.normal(ks[4], (d_proj, d_model), jnp.float32) * 0.2,  # Linear(d_model, d_proj).weight
        'ln_gamma': jnp.ones((d_proj,), jnp.float32),
        'ln_beta': jnp.zeros((d_proj,), jnp.float32),
    }
    inp = jax.random.normal(ks[5], (len_inp, d_model), jnp.float32)

    ref_out, ref_attn = reference_forward(
        inp, boundaries, params,
        d_l=d_l, d_k=d_k, d_v=d_v, d_model=d_model, d_proj=d_proj)

    # Strict f32 path: checked tightly against the torch-faithful reference.
    out_f32, attn_f32 = label_attention_forward(
        inp, boundaries, params,
        d_l=d_l, d_k=d_k, d_v=d_v, d_model=d_model, d_proj=d_proj,
        compute_dtype=jnp.float32)
    jax.block_until_ready(out_f32)
    jax.block_until_ready(attn_f32)
    assert out_f32.shape == (len_inp, d_l * d_proj)
    assert attn_f32.shape == (d_l * mb, 1, L)
    assert jnp.allclose(out_f32, ref_out, atol=2e-4, rtol=2e-4)
    assert jnp.allclose(attn_f32, ref_attn, atol=2e-4, rtol=2e-4)

    # Default bf16 streaming path (f32 accumulation / softmax / LayerNorm stats).
    out_bf16, attn_bf16 = label_attention_forward(
        inp, boundaries, params,
        d_l=d_l, d_k=d_k, d_v=d_v, d_model=d_model, d_proj=d_proj)
    jax.block_until_ready(out_bf16)
    assert jnp.allclose(out_bf16.astype(jnp.float32), ref_out, atol=0.15, rtol=0.15)
    assert jnp.allclose(attn_bf16, ref_attn, atol=0.05, rtol=0.15)

    # Attention-output-disabled path (skips kernel 1's largest write stream).
    out_na, attn_na = label_attention_forward(
        inp, boundaries, params,
        d_l=d_l, d_k=d_k, d_v=d_v, d_model=d_model, d_proj=d_proj,
        return_attn=False)
    jax.block_until_ready(out_na)
    assert attn_na is None
    assert jnp.allclose(out_na.astype(jnp.float32), ref_out, atol=0.15, rtol=0.15)

    print("KERNEL_OK")
</pallas_src>

<mosaic_0001>
module attributes {stable_mosaic.version = 11 : i64} {
  func.func @_attn_kernel(%arg0: i32, %arg1: memref<2xi32, #tpu.memory_space<smem>>, %arg2: memref<2xi32, #tpu.memory_space<smem>>, %arg3: memref<1x16x32xf32, #tpu.memory_space<vmem>>, %arg4: memref<2x4x32xf32, #tpu.memory_space<vmem>>, %arg5: memref<1x8x8xf32, #tpu.memory_space<vmem>>, %arg6: memref<1x8x32xf32, #tpu.memory_space<vmem>>) attributes {dimension_semantics = [#tpu.dimension_semantics<parallel>], iteration_bounds = array<i64: 1>, scalar_prefetch = 2 : i64, scratch_operands = 0 : i64, tpu.core_type = #tpu.core_type<tc>, window_params = [{transform_indices = @transform_0, window_bounds = array<i64: 1, 16, 32>}, {pipeline_mode = #tpu.pipeline_mode<synchronous>, transform_indices = @transform_1, window_bounds = array<i64: 2, 4, 32>}, {transform_indices = @transform_2, window_bounds = array<i64: 1, 8, 8>}, {transform_indices = @transform_3, window_bounds = array<i64: 1, 8, 32>}]} {
    %c2_i32 = arith.constant 2 : i32
    %0 = arith.muli %arg0, %c2_i32 : i32
    %c0_i32 = arith.constant 0 : i32
    %1 = arith.addi %0, %c0_i32 : i32
    %c2_i32_0 = arith.constant 2 : i32
    %c0_i32_1 = arith.constant 0 : i32
    %2 = arith.cmpi eq, %c2_i32_0, %c0_i32_1 : i32
    %c1_i32 = arith.constant 1 : i32
    %3 = arith.select %2, %c1_i32, %c2_i32_0 : i32
    %4 = arith.remsi %1, %3 : i32
    %c0_i32_2 = arith.constant 0 : i32
    %5 = arith.cmpi ne, %4, %c0_i32_2 : i32
    %c0_i32_3 = arith.constant 0 : i32
    %6 = arith.cmpi slt, %4, %c0_i32_3 : i32
    %c0_i32_4 = arith.constant 0 : i32
    %7 = arith.cmpi slt, %3, %c0_i32_4 : i32
    %8 = arith.xori %6, %7 : i1
    %9 = arith.andi %8, %5 : i1
    %10 = arith.addi %4, %3 : i32
    %11 = arith.select %9, %10, %4 : i32
    %12 = arith.index_cast %11 : i32 to index
    %c0 = arith.constant 0 : index
    %c0_5 = arith.constant 0 : index
    %13 = vector.load %arg4[%12, %c0, %c0_5] : memref<2x4x32xf32, #tpu.memory_space<vmem>>, vector<1x4x32xf32>
    %14 = vector.shape_cast %13 : vector<1x4x32xf32> to vector<4x32xf32>
    %15 = arith.index_cast %1 : i32 to index
    %16 = memref.load %arg1[%15] : memref<2xi32, #tpu.memory_space<smem>>
    %17 = tpu.assume_multiple %16, 8 : i32
    %18 = arith.index_cast %1 : i32 to index
    %19 = memref.load %arg2[%18] : memref<2xi32, #tpu.memory_space<smem>>
    %c0_6 = arith.constant 0 : index
    %20 = arith.index_cast %17 : i32 to index
    %c0_7 = arith.constant 0 : index
    %21 = vector.load %arg3[%c0_6, %20, %c0_7] : memref<1x16x32xf32, #tpu.memory_space<vmem>>, vector<1x8x32xf32>
    %22 = vector.shape_cast %21 : vector<1x8x32xf32> to vector<8x32xf32>
    %cst = arith.constant dense<0.000000e+00> : vector<4x8xf32>
    %23 = tpu.matmul %14, %22, %cst {dimension_numbers = #tpu.dot_dimension_numbers<[1], [1], [0], [0], [0, 0, 1, 0], [], []>} : vector<4x32xf32>, vector<8x32xf32>, vector<4x8xf32> -> vector<4x8xf32>
    %24 = tpu.iota {dimensions = array<i32: 1>} : vector<4x8xi32>
    %25 = vector.broadcast %19 : i32 to vector<4x8xi32>
    %26 = arith.cmpi slt, %24, %25 : vector<4x8xi32>
    %cst_8 = arith.constant -1.000000e+30 : f32
    %27 = vector.broadcast %cst_8 : f32 to vector<4x8xf32>
    %28 = arith.select %26, %23, %27 : vector<4x8xi1>, vector<4x8xf32>
    %cst_9 = arith.constant dense<0xFF800000> : vector<4xf32>
    %29 = vector.multi_reduction <maximumf>, %28, %cst_9 [1] : vector<4x8xf32> to vector<4xf32>
    %30 = vector.shape_cast %29 : vector<4xf32> to vector<4x1xf32>
    %31 = vector.broadcast %30 : vector<4x1xf32> to vector<4x8xf32>
    %32 = arith.subf %28, %31 : vector<4x8xf32>
    %33 = math.exp %32 : vector<4x8xf32>
    %cst_10 = arith.constant dense<0.000000e+00> : vector<4xf32>
    %34 = vector.multi_reduction <add>, %33, %cst_10 [1] : vector<4x8xf32> to vector<4xf32>
    %35 = vector.shape_cast %34 : vector<4xf32> to vector<4x1xf32>
    %36 = tpu.reciprocal %35 : vector<4x1xf32> -> vector<4x1xf32>
    %37 = vector.broadcast %36 : vector<4x1xf32> to vector<4x8xf32>
    %38 = arith.mulf %33, %37 : vector<4x8xf32>
    %c0_11 = arith.constant 0 : index
    %c0_12 = arith.constant 0 : index
    %c0_13 = arith.constant 0 : index
    %39 = vector.load %arg5[%c0_11, %c0_12, %c0_13] : memref<1x8x8xf32, #tpu.memory_space<vmem>>, vector<1x4x8xf32>
    %40 = vector.shape_cast %39 : vector<1x4x8xf32> to vector<4x8xf32>
    %41 = vector.shape_cast %38 : vector<4x8xf32> to vector<1x4x8xf32>
    tpu.vector_store %arg5[%c0_11, %c0_12, %c0_13], %41 {strides = array<i32>} : memref<1x8x8xf32, #tpu.memory_space<vmem>>, vector<1x4x8xf32>,
    %cst_14 = arith.constant dense<0.000000e+00> : vector<4x32xf32>
    %42 = tpu.matmul %38, %22, %cst_14 {dimension_numbers = #tpu.dot_dimension_numbers<[1], [0], [0], [1], [0, 0, 1, 1], [], []>} : vector<4x8xf32>, vector<8x32xf32>, vector<4x32xf32> -> vector<4x32xf32>
    %c0_15 = arith.constant 0 : index
    %c0_16 = arith.constant 0 : index
    %c0_17 = arith.constant 0 : index
    %43 = vector.load %arg6[%c0_15, %c0_16, %c0_17] : memref<1x8x32xf32, #tpu.memory_space<vmem>>, vector<1x4x32xf32>
    %44 = vector.shape_cast %43 : vector<1x4x32xf32> to vector<4x32xf32>
    %45 = vector.shape_cast %42 : vector<4x32xf32> to vector<1x4x32xf32>
    tpu.vector_store %arg6[%c0_15, %c0_16, %c0_17], %45 {strides = array<i32>} : memref<1x8x32xf32, #tpu.memory_space<vmem>>, vector<1x4x32xf32>,
    %c2_i32_18 = arith.constant 2 : i32
    %46 = arith.muli %arg0, %c2_i32_18 : i32
    %c1_i32_19 = arith.constant 1 : i32
    %47 = arith.addi %46, %c1_i32_19 : i32
    %c2_i32_20 = arith.constant 2 : i32
    %c0_i32_21 = arith.constant 0 : i32
    %48 = arith.cmpi eq, %c2_i32_20, %c0_i32_21 : i32
    %c1_i32_22 = arith.constant 1 : i32
    %49 = arith.select %48, %c1_i32_22, %c2_i32_20 : i32
    %50 = arith.remsi %47, %49 : i32
    %c0_i32_23 = arith.constant 0 : i32
    %51 = arith.cmpi ne, %50, %c0_i32_23 : i32
    %c0_i32_24 = arith.constant 0 : i32
    %52 = arith.cmpi slt, %50, %c0_i32_24 : i32
    %c0_i32_25 = arith.constant 0 : i32
    %53 = arith.cmpi slt, %49, %c0_i32_25 : i32
    %54 = arith.xori %52, %53 : i1
    %55 = arith.andi %54, %51 : i1
    %56 = arith.addi %50, %49 : i32
    %57 = arith.select %55, %56, %50 : i32
    %58 = arith.index_cast %57 : i32 to index
    %c0_26 = arith.constant 0 : index
    %c0_27 = arith.constant 0 : index
    %59 = vector.load %arg4[%58, %c0_26, %c0_27] : memref<2x4x32xf32, #tpu.memory_space<vmem>>, vector<1x4x32xf32>
    %60 = vector.shape_cast %59 : vector<1x4x32xf32> to vector<4x32xf32>
    %61 = arith.index_cast %47 : i32 to index
    %62 = memref.load %arg1[%61] : memref<2xi32, #tpu.memory_space<smem>>
    %63 = tpu.assume_multiple %62, 8 : i32
    %64 = arith.index_cast %47 : i32 to index
    %65 = memref.load %arg2[%64] : memref<2xi32, #tpu.memory_space<smem>>
    %c0_28 = arith.constant 0 : index
    %66 = arith.index_cast %63 : i32 to index
    %c0_29 = arith.constant 0 : index
    %67 = vector.load %arg3[%c0_28, %66, %c0_29] : memref<1x16x32xf32, #tpu.memory_space<vmem>>, vector<1x8x32xf32>
    %68 = vector.shape_cast %67 : vector<1x8x32xf32> to vector<8x32xf32>
    %cst_30 = arith.constant dense<0.000000e+00> : vector<4x8xf32>
    %69 = tpu.matmul %60, %68, %cst_30 {dimension_numbers = #tpu.dot_dimension_numbers<[1], [1], [0], [0], [0, 0, 1, 0], [], []>} : vector<4x32xf32>, vector<8x32xf32>, vector<4x8xf32> -> vector<4x8xf32>
    %70 = tpu.iota {dimensions = array<i32: 1>} : vector<4x8xi32>
    %71 = vector.broadcast %65 : i32 to vector<4x8xi32>
    %72 = arith.cmpi slt, %70, %71 : vector<4x8xi32>
    %cst_31 = arith.constant -1.000000e+30 : f32
    %73 = vector.broadcast %cst_31 : f32 to vector<4x8xf32>
    %74 = arith.select %72, %69, %73 : vector<4x8xi1>, vector<4x8xf32>
    %cst_32 = arith.constant dense<0xFF800000> : vector<4xf32>
    %75 = vector.multi_reduction <maximumf>, %74, %cst_32 [1] : vector<4x8xf32> to vector<4xf32>
    %76 = vector.shape_cast %75 : vector<4xf32> to vector<4x1xf32>
    %77 = vector.broadcast %76 : vector<4x1xf32> to vector<4x8xf32>
    %78 = arith.subf %74, %77 : vector<4x8xf32>
    %79 = math.exp %78 : vector<4x8xf32>
    %cst_33 = arith.constant dense<0.000000e+00> : vector<4xf32>
    %80 = vector.multi_reduction <add>, %79, %cst_33 [1] : vector<4x8xf32> to vector<4xf32>
    %81 = vector.shape_cast %80 : vector<4xf32> to vector<4x1xf32>
    %82 = tpu.reciprocal %81 : vector<4x1xf32> -> vector<4x1xf32>
    %83 = vector.broadcast %82 : vector<4x1xf32> to vector<4x8xf32>
    %84 = arith.mulf %79, %83 : vector<4x8xf32>
    %c0_34 = arith.constant 0 : index
    %c4 = arith.constant 4 : index
    %c0_35 = arith.constant 0 : index
    %85 = vector.load %arg5[%c0_34, %c4, %c0_35] : memref<1x8x8xf32, #tpu.memory_space<vmem>>, vector<1x4x8xf32>
    %86 = vector.shape_cast %85 : vector<1x4x8xf32> to vector<4x8xf32>
    %87 = vector.shape_cast %84 : vector<4x8xf32> to vector<1x4x8xf32>
    tpu.vector_store %arg5[%c0_34, %c4, %c0_35], %87 {strides = array<i32>} : memref<1x8x8xf32, #tpu.memory_space<vmem>>, vector<1x4x8xf32>,
    %cst_36 = arith.constant dense<0.000000e+00> : vector<4x32xf32>
    %88 = tpu.matmul %84, %68, %cst_36 {dimension_numbers = #tpu.dot_dimension_numbers<[1], [0], [0], [1], [0, 0, 1, 1], [], []>} : vector<4x8xf32>, vector<8x32xf32>, vector<4x32xf32> -> vector<4x32xf32>
    %c0_37 = arith.constant 0 : index
    %c4_38 = arith.constant 4 : index
    %c0_39 = arith.constant 0 : index
    %89 = vector.load %arg6[%c0_37, %c4_38, %c0_39] : memref<1x8x32xf32, #tpu.memory_space<vmem>>, vector<1x4x32xf32>
    %90 = vector.shape_cast %89 : vector<1x4x32xf32> to vector<4x32xf32>
    %91 = vector.shape_cast %88 : vector<4x32xf32> to vector<1x4x32xf32>
    tpu.vector_store %arg6[%c0_37, %c4_38, %c0_39], %91 {strides = array<i32>} : memref<1x8x32xf32, #tpu.memory_space<vmem>>, vector<1x4x32xf32>,
    return
  }
  func.func @transform_0(%arg0: i32, %arg1: memref<2xi32, #tpu.memory_space<smem>>, %arg2: memref<2xi32, #tpu.memory_space<smem>>) -> (i32, i32, i32) {
    %c0_i32 = arith.constant 0 : i32
    %c0_i32_0 = arith.constant 0 : i32
    %c0_i32_1 = arith.constant 0 : i32
    return %arg0, %c0_i32, %c0_i32_0 : i32, i32, i32
  }
  func.func @transform_1(%arg0: i32, %arg1: memref<2xi32, #tpu.memory_space<smem>>, %arg2: memref<2xi32, #tpu.memory_space<smem>>) -> (i32, i32, i32) {
    %c0_i32 = arith.constant 0 : i32
    %c0_i32_0 = arith.constant 0 : i32
    %c0_i32_1 = arith.constant 0 : i32
    %c0_i32_2 = arith.constant 0 : i32
    return %c0_i32, %c0_i32_0, %c0_i32_1 : i32, i32, i32
  }
  func.func @transform_2(%arg0: i32, %arg1: memref<2xi32, #tpu.memory_space<smem>>, %arg2: memref<2xi32, #tpu.memory_space<smem>>) -> (i32, i32, i32) {
    %c0_i32 = arith.constant 0 : i32
    %c0_i32_0 = arith.constant 0 : i32
    %c0_i32_1 = arith.constant 0 : i32
    return %arg0, %c0_i32, %c0_i32_0 : i32, i32, i32
  }
  func.func @transform_3(%arg0: i32, %arg1: memref<2xi32, #tpu.memory_space<smem>>, %arg2: memref<2xi32, #tpu.memory_space<smem>>) -> (i32, i32, i32) {
    %c0_i32 = arith.constant 0 : i32
    %c0_i32_0 = arith.constant 0 : i32
    %c0_i32_1 = arith.constant 0 : i32
    return %arg0, %c0_i32, %c0_i32_0 : i32, i32, i32
  }
}

</mosaic_0001>

<bundles_post_ra>
// kernel: tpu_custom_call.1
= control target key start
LH: loop header
LB: loop body
LE: loop exit
PB: predicated region body
PF: predicated region fallthrough
CT: control target
= control target key end

     0   :  { %s631_s18 = smov [#allocation3]   ;;  %s709_s0 = inlined_call_operand.hbm [shape: s32[2], index: 0, kind: input, shape index: {}]   ;;  %s710_s2 = inlined_call_operand.hbm [shape: f32[1,16,32], index: 2, kind: input, shape index: {}]   ;;  %s711_s3 = inlined_call_operand.hbm [shape: f32[2,4,32], index: 3, kind: input, shape index: {}]   ;;  %s712_s4 = inlined_call_operand.hbm [shape: f32[1,8,8], index: 4, kind: output, shape index: {0}]   ;;  %s713_s5 = inlined_call_operand.hbm [shape: f32[1,8,32], index: 5, kind: output, shape index: {1}]   ;;  %s714_s1 = inlined_call_operand.vmem [shape: s32[2], index: 1, kind: input, shape index: {}]  }
   0x1   :  { %12 = dma.hbm_to_smem %s709_s0, 16, %s631_s18, [#allocation2] }
   0x2   :  { %s13_s23 = sshll.u32 %s714_s1, 4  ;;  %s14_s23 = int_to_ptr.vmem [resolvable:$true] %s13_s23 }
   0x3   :  { %s529_s24 = scalar_lea.vmem %s14_s23, 16  ;;  %p534_p1 = scmp.lt.s32.totalorder %s14_s23, %s14_s23 }
   0x4   :  { %p530_p0 = scmp.ne.s32.totalorder %s14_s23, %s529_s24  ;;  %p535_p2 = scmp.lt.s32.totalorder %s529_s24, %s529_s24 }
   0x6   :  { %p536_p3 = por %p535_p2, %p534_p1 }
   0x8   :  { %p537_p4 = pnand %p536_p3, %p530_p0 }
   0xa   :  { %540 = shalt.err (!%p537_p4)  }
   0xb   :  { %s632_s25 = smov [#allocation4]  }
   0xc   :  { %16 = dma.vmem_to_smem %s14_s23, 16, %s632_s25, [#allocation2] }
   0xd   :  { %621 = dma.done.wait [#allocation2], 32 }
   0xe   :  { %622 = vsyncadd [#allocation2], 4294967264 }
   0xf   :  { %18 = sfence }
  0x10   :  { %19 = vsyncpa [#allocation6], 0 }
  0x11   :  { %20 = vsyncpa [#allocation9], 0 }
  0x12   :  { %21 = vsyncpa [#allocation7], 0 }
  0x13   :  { %22 = vsyncpa [#allocation12], 0  ;;  %s633_s0 = smov [#allocation5]  }
  0x14   :  { %s28_s26 = sshll.u32 %s633_s0, 4  ;;  %s29_s26 = int_to_ptr.vmem [resolvable:$true] %s28_s26 }
  0x15   :  { %s549_s1 = scalar_lea.vmem %s29_s26, 256  ;;  %p554_p6 = scmp.lt.s32.totalorder %s29_s26, %s29_s26 }
  0x16   :  { %p550_p5 = scmp.ne.s32.totalorder %s29_s26, %s549_s1  ;;  %p555_p7 = scmp.lt.s32.totalorder %s549_s1, %s549_s1 }
  0x18   :  { %p556_p8 = por %p555_p7, %p554_p6 }
  0x1a   :  { %p557_p9 = pnand %p556_p8, %p550_p5 }
  0x1c   :  { %560 = shalt.err (!%p557_p9)
}
  0x1d   :  { %s634_s27 = smov 128   ;;  %s635_s28 = smov 8  }
  0x1e   :  { %34 = dma.hbm_to_vmem [thread:$0]  %s710_s2, 256, %s29_s26, [#allocation6], %s634_s27, %s634_s27, %s635_s28  }
  0x1f   :  { %s636_s6 = smov [#allocation8]  }
  0x20   :  { %s40_s7 = sshll.u32 %s636_s6, 4  ;;  %s41_s7 = int_to_ptr.vmem [resolvable:$true] %s40_s7 }
  0x21   :  { %s569_s8 = scalar_lea.vmem %s41_s7, 128  ;;  %p574_p11 = scmp.lt.s32.totalorder %s41_s7, %s41_s7 }
  0x22   :  { %p570_p10 = scmp.ne.s32.totalorder %s41_s7, %s569_s8  ;;  %p575_p12 = scmp.lt.s32.totalorder %s569_s8, %s569_s8 }
  0x24   :  { %p576_p13 = por %p575_p12, %p574_p11 }
  0x26   :  { %p577_p0 = pnand %p576_p13, %p570_p10 }
  0x28   :  { %580 = shalt.err (!%p577_p0)
}
  0x29   :  { %s637_s9 = smov 64   ;;  %s638_s10 = smov 4  }
  0x2a   :  { %46 = dma.hbm_to_vmem [thread:$0]  %s711_s3, 128, %s41_s7, [#allocation9], %s637_s9, %s637_s9, %s638_s10  }
  0x2b   :  { %623 = dma.done.wait [#allocation6], 256  }
  0x2c   :  { %624 = vsyncadd [#allocation6], 4294967040 }
  0x2d   :  { %625 = dma.done.wait [#allocation9], 128  }
  0x2e   :  { %626 = vsyncadd [#allocation9], 4294967168  ;;  %v639_v0 = vmov 0.0   ;;  %s69_s2 = sld [smem:[#allocation3]]  ;;  %vm640_vm0 = vmmov 0   ;;  %vm73_vm1 = vcmask 261120   ;;  %v150_v3 = vlaneseq }
  0x2f   :  { %481 = vmatprep.subr.mxu0 %v639_v0  ;;  %483 = vmatprep.mubr.msk.f32.mxu0 %vm640_vm0, %v639_v0  ;;  %v68_v2 = vld [vmem:[#allocation8] sm:$0xf]  ;;  %s70_s3 = sld [smem:[#allocation4]]  ;;  %vm155_vm3 = vcmask 60416   ;;  %vm168_vm4 = vcmask 64512   ;;  %vm242_vm5 = vcmask 257024  }
  0x30   :  { %486 = vmatprep.subr.mxu1 %v639_v0  ;;  %488 = vmatprep.mubr.msk.f32.mxu1 %vm640_vm0, %v639_v0  ;;  %v151_v4 = vand.u32 127, %v150_v3  ;;  %s468_s14 = sld [smem:[#allocation3 + $0x1]]  ;;  %v259_v19 = vld [vmem:[#allocation8 + $0x4] sm:$0xf]  ;;  %s641_s17 = smov [#allocation10]  }
  0x31   :  { %s469_s16 = sld [smem:[#allocation4 + $0x1]]  ;;  %s435_s18 = sshll.u32 %s641_s17, 4  ;;  %s436_s18 = int_to_ptr.vmem [resolvable:$true] %s435_s18 }
  0x32   :  { %s581_s19 = scalar_lea.vmem %s436_s18, 128  ;;  %p586_p2 = scmp.lt.s32.totalorder %s436_s18, %s436_s18 }
  0x33   :  { %p582_p1 = scmp.ne.s32.totalorder %s436_s18, %s581_s19  ;;  %p587_p3 = scmp.lt.s32.totalorder %s581_s19, %s581_s19 }
  0x34   :  { %s71_s13 = scalar_lea.vmem [#allocation5], %s69_s2 }
  0x35   :  { %v72_v1 = vld [vmem:[%s71_s13] sm:$0xff]  ;;  %v152_v5 = vstv %s70_s3  ;;  %p588_p4 = por %p587_p3, %p586_p2 }
  0x36   :  { %482 = vmatpush3.xpose.msk.msra.mxu0 %vm73_vm1, %v72_v1  ;;  %487 = vmatpush3.msra.mxu1 %v72_v1  ;;  %vm153_vm2 = vcmp.lt.s32.totalorder %v151_v4, %v152_v5  ;;  %s262_s15 = scalar_lea.vmem [#allocation5], %s468_s14 }
  0x37   :  { %491 = vmatprep.subr.mxu1 %v639_v0  ;;  %496 = vmatprep.subr.mxu0 %v639_v0  ;;  %v263_v15 = vld [vmem:[%s262_s15] sm:$0xff]  ;;  %v340_v20 = vstv %s469_s16  ;;  %p589_p5 = pnand %p588_p4, %p582_p1 }
  0x38   :  { %vm341_vm6 = vcmp.lt.s32.totalorder %v151_v4, %v340_v20 }
  0x39   :  { %484 = vmatmul.mubr.msk.f32.vlgmr.msra.gmra.mxu0 %vm73_vm1, %v68_v2 }
  0x3a   :  { %498 = vmatprep.mubr.msk.f32.mxu0 %vm640_vm0, %v639_v0  ;;  %497 = vmatpush3.msra.mxu0 %v263_v15 }
  0xf9   :  { %v146_v6 = vpop.f32.mrf.mxu0 }
  0xfa   :  { %v154_v7 = vsel %vm153_vm2, %v146_v6, -1e+30 }
  0xfb   :  { %v485_v8 = vpop.f32.mrf.mxu0  ;;  %v156_v9 = vsel %vm155_vm3, %v154_v7, -inf }
  0xfc   :  { %157 = vmax.xlane.f32.xlu0 %v156_v9 }
 0x185   :  { %v158_v10 = vpop.xlane.xlu0 %157 }
 0x186   :  { %v159_v11 = vsub.f32 %v154_v7, %v158_v10 }
 0x188   :  { %v160_v12 = vmul.f32 1.442695, %v159_v11 }
 0x18a   :  { %513 = vpow2.f32 %v160_v12 }
 0x197   :  { %v514_v13 = vpop.eup %513 }
 0x198   :  { %v162_v14 = vsel %vm155_vm3, %v514_v13, 0.0 }
 0x199   :  { %163 = vadd.xlane.f32.xlu0 %v162_v14 }
 0x222   :  { %v164_v16 = vpop.xlane.xlu0 %163 }
 0x223   :  { %515 = vrcp.f32 %v164_v16 }
 0x230   :  { %v516_v17 = vpop.eup %515 }
 0x231   :  { %v166_v18 = vmul.f32 %v516_v17, %v514_v13 }
 0x233   :  { %489 = vmatmul.mubr.msk.f32.vlgmr.msra.gmra.mxu1 %vm168_vm4, %v166_v18  ;;  %167 = vst.msk [vmem:[#allocation10] sm:$0xf] %vm155_vm3, %v166_v18 }
 0x234   :  { %492 = vmatpush3.xpose.msk.msra.mxu1 %vm73_vm1, %v263_v15  ;;  %493 = vmatprep.mubr.msk.f32.mxu1 %vm640_vm0, %v639_v0 }
 0x237   :  { %494 = vmatmul.mubr.msk.f32.vlgmr.msra.gmra.mxu1 %vm73_vm1, %v259_v19 }
 0x2f3   :  { %v238_v21 = vpop.f32.mrf.mxu1 }
 0x2f4   :  { %243 = vst.msk [vmem:[#allocation11] sm:$0xf] %vm242_vm5, %v238_v21 }
 0x2f5   :  { %v490_v22 = vpop.f32.mrf.mxu1 }
 0x2f7   :  { %v336_v23 = vpop.f32.mrf.mxu1 }
 0x2f8   :  { %v342_v24 = vsel %vm341_vm6, %v336_v23, -1e+30 }
 0x2f9   :  { %v495_v25 = vpop.f32.mrf.mxu1  ;;  %v343_v26 = vsel %vm155_vm3, %v342_v24, -inf }
 0x2fa   :  { %344 = vmax.xlane.f32.xlu1 %v343_v26 }
 0x383   :  { %v345_v27 = vpop.xlane.xlu1 %344 }
 0x384   :  { %v346_v28 = vsub.f32 %v342_v24, %v345_v27 }
 0x386   :  { %v347_v29 = vmul.f32 1.442695, %v346_v28 }
 0x388   :  { %517 = vpow2.f32 %v347_v29 }
 0x395   :  { %v518_v30 = vpop.eup %517 }
 0x396   :  { %v349_v31 = vsel %vm155_vm3, %v518_v30, 0.0 }
 0x397   :  { %350 = vadd.xlane.f32.xlu1 %v349_v31 }
 0x420   :  { %v351_v32 = vpop.xlane.xlu1 %350 }
 0x421   :  { %519 = vrcp.f32 %v351_v32 }
 0x42e   :  { %v520_v33 = vpop.eup %519 }
 0x42f   :  { %v353_v34 = vmul.f32 %v520_v33, %v518_v30 }
 0x431   :  { %499 = vmatmul.mubr.msk.f32.vlgmr.msra.gmra.mxu0 %vm168_vm4, %v353_v34  ;;  %354 = vst.msk [vmem:[#allocation10 + $0x4] sm:$0xf] %vm155_vm3, %v353_v34 }
 0x432   :  { %592 = shalt.err (!%p589_p5)
}
 0x433   :  { %438 = dma.vmem_to_hbm [thread:$0]  %s436_s18, 128, %s712_s4, [#allocation7]  }
 0x434   :  { %s642_s22 = smov [#allocation11]  }
 0x435   :  { %s445_s23 = sshll.u32 %s642_s22, 4  ;;  %s446_s23 = int_to_ptr.vmem [resolvable:$true] %s445_s23 }
 0x436   :  { %s601_s24 = scalar_lea.vmem %s446_s23, 128  ;;  %p606_p7 = scmp.lt.s32.totalorder %s446_s23, %s446_s23 }
 0x437   :  { %p602_p6 = scmp.ne.s32.totalorder %s446_s23, %s601_s24  ;;  %p607_p8 = scmp.lt.s32.totalorder %s601_s24, %s601_s24 }
 0x439   :  { %p608_p9 = por %p607_p8, %p606_p7 }
 0x43b   :  { %p609_p10 = pnand %p608_p9, %p602_p6 }
 0x4f1   :  { %v424_v35 = vpop.f32.mrf.mxu0 }
 0x4f2   :  { %428 = vst.msk [vmem:[#allocation11 + $0x4] sm:$0xf] %vm242_vm5, %v424_v35 }
 0x4f3   :  { %v500_v36 = vpop.f32.mrf.mxu0 }
 0x4f4   :  { %612 = shalt.err (!%p609_p10)
}
 0x4f5   :  { %448 = dma.vmem_to_hbm [thread:$0]  %s446_s23, 128, %s713_s5, [#allocation12]  }
 0x4f6   :  { %627 = dma.done.wait [#allocation7], 128  }
 0x4f7   :  { %628 = vsyncadd [#allocation7], 4294967168 }
 0x4f8   :  { %629 = dma.done.wait [#allocation12], 128  }
 0x4f9   :  { %630 = vsyncadd [#allocation12], 4294967168 }
 0x4fa   :  { %455 = vsyncpa [#allocation6], 1 }
 0x4fb   :  { %456 = vsyncpa [#allocation9], 1 }
 0x4fc   :  { %457 = vsyncpa [#allocation7], 1 }
 0x4fd   :  { %458 = vsyncpa [#allocation12], 1 }

</bundles_post_ra>
